<compile_context>
chip_gen: v7x
topology: tpu7x:2x2x1
jax: 0.10.0
libtpu: 0.0.40
codegen_flags: <defaults>
</compile_context>

<pallas_src>
import jax
import jax.numpy as jnp
from jax.experimental import pallas as pl
from jax.experimental.pallas import tpu as pltpu

B, C_IN, T, H, Z = 2, 8, 128, 16, 8

# ---- packed-parameter layout -------------------------------------------------
# Weight slab (6, 48, 16): one (rows, K<=16) matrix per fused MXU dot.
S_IP, S_H, S_GP, S_G, S_DEC, S_GO = range(6)
# Bias slab (4, 48, 1): one bias block per fused dot that still needs one
# (IP bias is folded via the ones row; GO/BY biases are folded into the S_G rows).
B_H, B_GP, B_G, B_DEC = range(4)
W_SLOTS, W_ROWS, W_K = 6, 48, 16
B_SLOTS = 4


_PARAM_ORDER = ["ip", "ar", "gp", "qloc", "qsc", "ploc", "psc", "dec", "by", "go"]
_DIMS = {
    "ip": (H, C_IN), "ar": (H, H), "gp": (H, H),
    "qloc": (Z, 2 * H), "qsc": (Z, 2 * H),
    "ploc": (Z, H), "psc": (Z, H),
    "dec": (H, Z), "by": (H, H), "go": (C_IN, H),
}


def make_params(key):
    def lin(k, f_out, f_in):
        k1, k2 = jax.random.split(k)
        w = jax.random.normal(k1, (f_out, f_in), jnp.float32) / jnp.sqrt(
            jnp.float32(f_in))
        b = 0.01 * jax.random.normal(k2, (f_out,), jnp.float32)
        return w, b

    keys = jax.random.split(key, len(_PARAM_ORDER))
    return {name: lin(k, *_DIMS[name]) for name, k in zip(_PARAM_ORDER, keys)}


def pack_params(params, dtype=jnp.bfloat16):
    """Pack all weights into a fused (6,48,16) slab and biases into (4,48,1).

    The MXU operand dtype is the slab dtype (bf16 recommended for v5e/v6e/v7x);
    biases stay f32 (they are added after the f32 accumulation).
    """
    w = jnp.zeros((W_SLOTS, W_ROWS, W_K), jnp.float32)
    b = jnp.zeros((B_SLOTS, W_ROWS, 1), jnp.float32)

    w_ip, b_ip = params["ip"]
    w_ar, b_ar = params["ar"]
    w_gp, b_gp = params["gp"]
    w_ql, b_ql = params["qloc"]
    w_qs, b_qs = params["qsc"]
    w_pl, b_pl = params["ploc"]
    w_ps, b_ps = params["psc"]
    w_de, b_de = params["dec"]
    w_by, b_by = params["by"]
    w_go, b_go = params["go"]

    # inf_pre: [W_ip | b_ip] applied to the ones-augmented input.
    w = w.at[S_IP, :H, :C_IN].set(w_ip).at[S_IP, :H, C_IN].set(b_ip)

    # fused h-dot: rows [ar_conn(16) ; q_loc h-half(8) ; q_scale h-half(8)].
    w = w.at[S_H, 0:H, :H].set(w_ar)
    w = w.at[S_H, H:H + Z, :H].set(w_ql[:, :H])
    w = w.at[S_H, H + Z:H + 2 * Z, :H].set(w_qs[:, :H])
    b = b.at[B_H, 0:H, 0].set(b_ar)
    b = b.at[B_H, H:H + Z, 0].set(b_ql)
    b = b.at[B_H, H + Z:H + 2 * Z, 0].set(b_qs)

    # gen_pre.
    w = w.at[S_GP, :H, :H].set(w_gp)
    b = b.at[B_GP, :H, 0].set(b_gp)

    # fused g-dot: rows [q_loc g-half(8) ; q_scale g-half(8) ; p_loc(8) ;
    #                    p_scale(8) ; gen_post∘bypass(8)].
    # NOTE: q_loc / q_scale biases are applied once on the h-half (rows of B_H),
    # so the corresponding B_G rows are intentionally left at zero.
    w_goby = w_go @ w_by                       # (C_IN, H) composite gen_post∘bypass
    b_goby = w_go @ b_by + b_go                # folded bypass + gen_post bias
    w = w.at[S_G, 0:Z, :H].set(w_ql[:, H:])
    w = w.at[S_G, Z:2 * Z, :H].set(w_qs[:, H:])
    w = w.at[S_G, 2 * Z:3 * Z, :H].set(w_pl)
    w = w.at[S_G, 3 * Z:4 * Z, :H].set(w_ps)
    w = w.at[S_G, 4 * Z:4 * Z + C_IN, :H].set(w_goby)
    b = b.at[B_G, 2 * Z:3 * Z, 0].set(b_pl)
    b = b.at[B_G, 3 * Z:4 * Z, 0].set(b_ps)
    b = b.at[B_G, 4 * Z:4 * Z + C_IN, 0].set(b_goby)

    # latent_dec.
    w = w.at[S_DEC, :H, :Z].set(w_de)
    b = b.at[B_DEC, :H, 0].set(b_de)

    # gen_post (applied to dec only; its bias lives in the S_G composite rows).
    w = w.at[S_GO, :C_IN, :H].set(w_go)

    return w.astype(dtype), b


def ladder_forward(x_nct, eps_nzt, w_slab, b_narrow, lengths=None):
    """x_nct: [B, C_IN, T] (PyTorch NCW).  eps_nzt: [B, Z, T] rsample noise."""
    x = x_nct.astype(jnp.float32)
    eps = eps_nzt.astype(jnp.float32)
    Bv, Cv, Tv = x.shape
    Lv = Bv * Tv
    assert Lv % 128 == 0 and Cv + 1 <= W_K and Tv % 128 == 0
    dt = w_slab.dtype

    # Fold batch into the lane axis: [B, C, T] -> (C, B*T); append a ones row so
    # the inf_pre bias rides inside the MXU dot.  Rows Cv+1..W_K stay zero.
    x_flat = jnp.transpose(x, (1, 0, 2)).reshape(Cv, Lv)
    x_aug = jnp.zeros((W_K, Lv), jnp.float32).at[:Cv].set(x_flat).at[Cv].set(1.0)
    x_aug = x_aug.astype(dt)
    eps_flat = jnp.transpose(eps, (1, 0, 2)).reshape(Z, Lv)
    # Pre-broadcast biases to full lane width (no runtime lane-broadcasts).
    b_slab = jnp.broadcast_to(b_narrow, (B_SLOTS, W_ROWS, Lv))

    out_rows = Cv + 5 * Z      # [out ; q_loc ; q_scale ; p_loc ; p_scale ; z]

    def kernel(x_ref, eps_ref, w_ref, b_ref, o_ref):
        xq = x_ref[...]                 # (W_K, L)  already in MXU dtype
        ep = eps_ref[...]               # (Z, L)    f32

        def mm(slot, a, rows, k):
            # (rows, k) x (k, L) -> (rows, L), f32 accumulation on the MXU.
            return jnp.dot(w_ref[slot, :rows, :k], a.astype(dt),
                           preferred_element_type=jnp.float32)

        # inf_pre (bias folded into the augmented ones row of x).
        h = jnp.tanh(mm(S_IP, xq, H, W_K))                                # (H, L)

        # fused h-dot: [ar_conn ; q_loc h-half ; q_scale h-half].
        fh = mm(S_H, h, H + 2 * Z, H) + b_ref[B_H, :H + 2 * Z, :]
        ar = fh[:H]
        qloc_h = fh[H:H + Z]
        qsc_h = fh[H + Z:H + 2 * Z]

        # causal shift F.pad(ar[:, :, :-1], [1, 0]); batch is folded into lanes,
        # so mask (t % T)==0 to stop the roll leaking across batch boundaries.
        t_idx = jax.lax.broadcasted_iota(jnp.int32, (H, Lv), 1)
        ar_shift = jnp.where(t_idx % Tv == 0, 0.0,
                             pltpu.roll(ar, shift=1, axis=1))

        # gen_pre (gen_data_in is None since sublayer is None).
        g = jnp.tanh(mm(S_GP, ar_shift, H, H) + b_ref[B_GP, :H, :])       # (H, L)

        # fused g-dot: [q_loc g-half ; q_scale g-half ; p_loc ; p_scale ;
        #               gen_post∘bypass].
        fg = mm(S_G, g, 4 * Z + Cv, H) + b_ref[B_G, :4 * Z + Cv, :]
        q_loc = qloc_h + fg[0:Z]
        q_scale = jax.nn.softplus(qsc_h + fg[Z:2 * Z])
        p_loc = fg[2 * Z:3 * Z]
        p_scale = jax.nn.softplus(fg[3 * Z:4 * Z])
        goby = fg[4 * Z:4 * Z + Cv]

        # rsample, latent_dec, gen_post (bypass pre-composed into goby).
        z = q_loc + q_scale * ep                                          # (Z, L)
        dec = jnp.tanh(mm(S_DEC, z, H, Z) + b_ref[B_DEC, :H, :])          # (H, L)
        out = goby + mm(S_GO, dec, Cv, H)                                 # (Cv, L)

        # single lane-dense output slab.
        o_ref[0:Cv, :] = out
        o_ref[Cv + 0 * Z:Cv + 1 * Z, :] = q_loc
        o_ref[Cv + 1 * Z:Cv + 2 * Z, :] = q_scale
        o_ref[Cv + 2 * Z:Cv + 3 * Z, :] = p_loc
        o_ref[Cv + 3 * Z:Cv + 4 * Z, :] = p_scale
        o_ref[Cv + 4 * Z:Cv + 5 * Z, :] = z

    slab = pl.pallas_call(
        kernel,
        out_shape=jax.ShapeDtypeStruct((out_rows, Lv), jnp.float32),
        grid=(1,),
        in_specs=[
            pl.BlockSpec((W_K, Lv), lambda i: (0, 0)),                    # x (aug)
            pl.BlockSpec((Z, Lv), lambda i: (0, 0)),                      # eps
            pl.BlockSpec((W_SLOTS, W_ROWS, W_K), lambda i: (0, 0, 0)),    # weights
            pl.BlockSpec((B_SLOTS, W_ROWS, Lv), lambda i: (0, 0, 0)),     # biases
        ],
        out_specs=pl.BlockSpec((out_rows, Lv), lambda i: (0, 0)),
        compiler_params=pltpu.CompilerParams(
            dimension_semantics=("arbitrary",)),
    )(x_aug, eps_flat, w_slab, b_slab)

    # Unfold lanes back to [B, ·, T] and split the slab.
    r = slab.reshape(out_rows, Bv, Tv).transpose(1, 0, 2)
    out = r[:, 0:Cv]
    latent_state = {
        "q_loc": r[:, Cv + 0 * Z:Cv + 1 * Z],
        "q_scale": r[:, Cv + 1 * Z:Cv + 2 * Z],
        "p_loc": r[:, Cv + 2 * Z:Cv + 3 * Z],
        "p_scale": r[:, Cv + 3 * Z:Cv + 4 * Z],
        "sample": r[:, Cv + 4 * Z:Cv + 5 * Z],
        "lengths": lengths,
    }
    return out, [latent_state]


def ladder_forward_ref(x_nct, eps_nzt, params):
    """Pure-JAX NCW f32 reference mirroring the PyTorch forward (for validation)."""
    x = x_nct.astype(jnp.float32)
    eps = eps_nzt.astype(jnp.float32)

    def conv1x1(a, wb):
        w, b = wb
        return jnp.einsum("oi,bit->bot", w, a) + b[None, :, None]

    h = jnp.tanh(conv1x1(x, params["ip"]))
    ar = conv1x1(h, params["ar"])
    ar_shift = jnp.pad(ar[:, :, :-1], ((0, 0), (0, 0), (1, 0)))
    g = jnp.tanh(conv1x1(ar_shift, params["gp"]))
    q = jnp.concatenate([h, g], axis=1)
    q_loc = conv1x1(q, params["qloc"])
    q_scale = jax.nn.softplus(conv1x1(q, params["qsc"]))
    p_loc = conv1x1(g, params["ploc"])
    p_scale = jax.nn.softplus(conv1x1(g, params["psc"]))
    z = q_loc + q_scale * eps
    dec = jnp.tanh(conv1x1(z, params["dec"]))
    byp = conv1x1(g, params["by"])
    out = conv1x1(byp + dec, params["go"])
    return {"out": out, "q_loc": q_loc, "q_scale": q_scale,
            "p_loc": p_loc, "p_scale": p_scale, "sample": z}


def _check(out, ls, ref, atol, rtol, tag):
    checks = [
        ("out", out, ref["out"]),
        ("q_loc", ls[0]["q_loc"], ref["q_loc"]),
        ("q_scale", ls[0]["q_scale"], ref["q_scale"]),
        ("p_loc", ls[0]["p_loc"], ref["p_loc"]),
        ("p_scale", ls[0]["p_scale"], ref["p_scale"]),
        ("sample", ls[0]["sample"], ref["sample"]),
    ]
    for name, got, want in checks:
        assert got.shape == want.shape, (tag, name, got.shape, want.shape)
        assert jnp.allclose(got, want, atol=atol, rtol=rtol), (tag, name)


if __name__ == "__main__":
    key = jax.random.PRNGKey(0)
    k_param, k_x, k_eps = jax.random.split(key, 3)

    params = make_params(k_param)
    x = jax.random.normal(k_x, (B, C_IN, T), jnp.float32)      # PyTorch NCW input
    eps = jax.random.normal(k_eps, (B, Z, T), jnp.float32)     # rsample noise
    ref = ladder_forward_ref(x, eps, params)

    # 1) strict structural check: f32 MXU operands, tight tolerance.
    w32, b_nar = pack_params(params, dtype=jnp.float32)
    out32, ls32 = ladder_forward(x, eps, w32, b_nar, lengths=None)
    out32 = jax.block_until_ready(out32)
    _check(out32, ls32, ref, atol=1e-4, rtol=1e-4, tag="f32")

    # 2) fast path: bf16 MXU operands (recommended on v5e/v6e/v7x); the f32
    #    reference is only matched to bf16 accuracy, so the tolerance is loose.
    wbf, b_nar = pack_params(params, dtype=jnp.bfloat16)
    out, ls = ladder_forward(x, eps, wbf, b_nar, lengths=None)
    out = jax.block_until_ready(out)
    assert out.shape == x.shape, (out.shape, x.shape)
    _check(out, ls, ref, atol=1e-1, rtol=1e-1, tag="bf16")

    print("KERNEL_OK")
</pallas_src>

<mosaic_0001>
module attributes {stable_mosaic.version = 11 : i64} {
  func.func @kernel(%arg0: i32, %arg1: memref<16x256xf32, #tpu.memory_space<vmem>>, %arg2: memref<8x256xf32, #tpu.memory_space<vmem>>, %arg3: memref<6x48x16xf32, #tpu.memory_space<vmem>>, %arg4: memref<4x48x256xf32, #tpu.memory_space<vmem>>, %arg5: memref<48x256xf32, #tpu.memory_space<vmem>>) attributes {dimension_semantics = [#tpu.dimension_semantics<arbitrary>], iteration_bounds = array<i64: 1>, scalar_prefetch = 0 : i64, scratch_operands = 0 : i64, tpu.core_type = #tpu.core_type<tc>, window_params = [{pipeline_mode = #tpu.pipeline_mode<synchronous>, transform_indices = @transform_0, window_bounds = array<i64: 16, 256>}, {pipeline_mode = #tpu.pipeline_mode<synchronous>, transform_indices = @transform_1, window_bounds = array<i64: 8, 256>}, {pipeline_mode = #tpu.pipeline_mode<synchronous>, transform_indices = @transform_2, window_bounds = array<i64: 6, 48, 16>}, {pipeline_mode = #tpu.pipeline_mode<synchronous>, transform_indices = @transform_3, window_bounds = array<i64: 4, 48, 256>}, {pipeline_mode = #tpu.pipeline_mode<synchronous>, transform_indices = @transform_4, window_bounds = array<i64: 48, 256>}]} {
    %c0 = arith.constant 0 : index
    %c0_0 = arith.constant 0 : index
    %0 = vector.load %arg1[%c0, %c0_0] : memref<16x256xf32, #tpu.memory_space<vmem>>, vector<16x256xf32>
    %c0_1 = arith.constant 0 : index
    %c0_2 = arith.constant 0 : index
    %1 = vector.load %arg2[%c0_1, %c0_2] : memref<8x256xf32, #tpu.memory_space<vmem>>, vector<8x256xf32>
    %c0_3 = arith.constant 0 : index
    %c0_4 = arith.constant 0 : index
    %c0_5 = arith.constant 0 : index
    %2 = vector.load %arg3[%c0_3, %c0_4, %c0_5] : memref<6x48x16xf32, #tpu.memory_space<vmem>>, vector<1x16x16xf32>
    %3 = vector.shape_cast %2 : vector<1x16x16xf32> to vector<16x16xf32>
    %cst = arith.constant dense<0.000000e+00> : vector<16x256xf32>
    %4 = tpu.matmul %3, %0, %cst {dimension_numbers = #tpu.dot_dimension_numbers<[1], [0], [0], [1], [0, 0, 1, 1], [], []>} : vector<16x16xf32>, vector<16x256xf32>, vector<16x256xf32> -> vector<16x256xf32>
    %5 = math.tanh %4 : vector<16x256xf32>
    %c1 = arith.constant 1 : index
    %c0_6 = arith.constant 0 : index
    %c0_7 = arith.constant 0 : index
    %6 = vector.load %arg3[%c1, %c0_6, %c0_7] : memref<6x48x16xf32, #tpu.memory_space<vmem>>, vector<1x32x16xf32>
    %7 = vector.shape_cast %6 : vector<1x32x16xf32> to vector<32x16xf32>
    %cst_8 = arith.constant dense<0.000000e+00> : vector<32x256xf32>
    %8 = tpu.matmul %7, %5, %cst_8 {dimension_numbers = #tpu.dot_dimension_numbers<[1], [0], [0], [1], [0, 0, 1, 1], [], []>} : vector<32x16xf32>, vector<16x256xf32>, vector<32x256xf32> -> vector<32x256xf32>
    %c0_9 = arith.constant 0 : index
    %c0_10 = arith.constant 0 : index
    %c0_11 = arith.constant 0 : index
    %9 = vector.load %arg4[%c0_9, %c0_10, %c0_11] : memref<4x48x256xf32, #tpu.memory_space<vmem>>, vector<1x32x256xf32>
    %10 = vector.shape_cast %9 : vector<1x32x256xf32> to vector<32x256xf32>
    %11 = arith.addf %8, %10 : vector<32x256xf32>
    %12 = vector.extract_strided_slice %11 {offsets = [0, 0], sizes = [16, 256], strides = [1, 1]} : vector<32x256xf32> to vector<16x256xf32>
    %13 = vector.extract_strided_slice %11 {offsets = [16, 0], sizes = [8, 256], strides = [1, 1]} : vector<32x256xf32> to vector<8x256xf32>
    %14 = vector.extract_strided_slice %11 {offsets = [24, 0], sizes = [8, 256], strides = [1, 1]} : vector<32x256xf32> to vector<8x256xf32>
    %15 = tpu.iota {dimensions = array<i32: 1>} : vector<16x256xi32>
    %c128_i32 = arith.constant 128 : i32
    %c0_i32 = arith.constant 0 : i32
    %16 = arith.cmpi eq, %c128_i32, %c0_i32 : i32
    %c1_i32 = arith.constant 1 : i32
    %17 = arith.select %16, %c1_i32, %c128_i32 : i32
    %18 = vector.broadcast %17 : i32 to vector<16x256xi32>
    %19 = arith.remsi %15, %18 : vector<16x256xi32>
    %c0_i32_12 = arith.constant 0 : i32
    %20 = vector.broadcast %c0_i32_12 : i32 to vector<16x256xi32>
    %21 = arith.cmpi ne, %19, %20 : vector<16x256xi32>
    %c0_i32_13 = arith.constant 0 : i32
    %22 = vector.broadcast %c0_i32_13 : i32 to vector<16x256xi32>
    %23 = arith.cmpi slt, %19, %22 : vector<16x256xi32>
    %c0_i32_14 = arith.constant 0 : i32
    %24 = arith.cmpi slt, %17, %c0_i32_14 : i32
    %25 = vector.broadcast %24 : i1 to vector<16x256xi1>
    %26 = vector.broadcast %25 : vector<16x256xi1> to vector<16x256xi1>
    %27 = arith.xori %23, %26 : vector<16x256xi1>
    %28 = arith.andi %27, %21 : vector<16x256xi1>
    %29 = vector.broadcast %17 : i32 to vector<16x256xi32>
    %30 = arith.addi %19, %29 : vector<16x256xi32>
    %31 = arith.select %28, %30, %19 : vector<16x256xi1>, vector<16x256xi32>
    %c0_i32_15 = arith.constant 0 : i32
    %32 = vector.broadcast %c0_i32_15 : i32 to vector<16x256xi32>
    %33 = arith.cmpi eq, %31, %32 : vector<16x256xi32>
    %c1_i32_16 = arith.constant 1 : i32
    %34 = tpu.dynamic_rotate %12 by %c1_i32_16 dim 1 : vector<16x256xf32>, i32 -> vector<16x256xf32>
    %cst_17 = arith.constant 0.000000e+00 : f32
    %35 = vector.broadcast %cst_17 : f32 to vector<16x256xf32>
    %36 = arith.select %33, %35, %34 : vector<16x256xi1>, vector<16x256xf32>
    %c2 = arith.constant 2 : index
    %c0_18 = arith.constant 0 : index
    %c0_19 = arith.constant 0 : index
    %37 = vector.load %arg3[%c2, %c0_18, %c0_19] : memref<6x48x16xf32, #tpu.memory_space<vmem>>, vector<1x16x16xf32>
    %38 = vector.shape_cast %37 : vector<1x16x16xf32> to vector<16x16xf32>
    %cst_20 = arith.constant dense<0.000000e+00> : vector<16x256xf32>
    %39 = tpu.matmul %38, %36, %cst_20 {dimension_numbers = #tpu.dot_dimension_numbers<[1], [0], [0], [1], [0, 0, 1, 1], [], []>} : vector<16x16xf32>, vector<16x256xf32>, vector<16x256xf32> -> vector<16x256xf32>
    %c1_21 = arith.constant 1 : index
    %c0_22 = arith.constant 0 : index
    %c0_23 = arith.constant 0 : index
    %40 = vector.load %arg4[%c1_21, %c0_22, %c0_23] : memref<4x48x256xf32, #tpu.memory_space<vmem>>, vector<1x16x256xf32>
    %41 = vector.shape_cast %40 : vector<1x16x256xf32> to vector<16x256xf32>
    %42 = arith.addf %39, %41 : vector<16x256xf32>
    %43 = math.tanh %42 : vector<16x256xf32>
    %c3 = arith.constant 3 : index
    %c0_24 = arith.constant 0 : index
    %c0_25 = arith.constant 0 : index
    %44 = vector.load %arg3[%c3, %c0_24, %c0_25] : memref<6x48x16xf32, #tpu.memory_space<vmem>>, vector<1x40x16xf32>
    %45 = vector.shape_cast %44 : vector<1x40x16xf32> to vector<40x16xf32>
    %cst_26 = arith.constant dense<0.000000e+00> : vector<40x256xf32>
    %46 = tpu.matmul %45, %43, %cst_26 {dimension_numbers = #tpu.dot_dimension_numbers<[1], [0], [0], [1], [0, 0, 1, 1], [], []>} : vector<40x16xf32>, vector<16x256xf32>, vector<40x256xf32> -> vector<40x256xf32>
    %c2_27 = arith.constant 2 : index
    %c0_28 = arith.constant 0 : index
    %c0_29 = arith.constant 0 : index
    %47 = vector.load %arg4[%c2_27, %c0_28, %c0_29] : memref<4x48x256xf32, #tpu.memory_space<vmem>>, vector<1x40x256xf32>
    %48 = vector.shape_cast %47 : vector<1x40x256xf32> to vector<40x256xf32>
    %49 = arith.addf %46, %48 : vector<40x256xf32>
    %50 = vector.extract_strided_slice %49 {offsets = [0, 0], sizes = [8, 256], strides = [1, 1]} : vector<40x256xf32> to vector<8x256xf32>
    %51 = arith.addf %13, %50 : vector<8x256xf32>
    %52 = vector.extract_strided_slice %49 {offsets = [8, 0], sizes = [8, 256], strides = [1, 1]} : vector<40x256xf32> to vector<8x256xf32>
    %53 = arith.addf %14, %52 : vector<8x256xf32>
    %cst_30 = arith.constant 0.000000e+00 : f32
    %54 = vector.broadcast %cst_30 : f32 to vector<8x256xf32>
    %55 = arith.maximumf %53, %54 : vector<8x256xf32>
    %56 = vector.broadcast %cst_30 : f32 to vector<8x256xf32>
    %57 = arith.subf %53, %56 : vector<8x256xf32>
    %58 = arith.cmpf one, %57, %57 : vector<8x256xf32>
    %59 = vector.broadcast %cst_30 : f32 to vector<8x256xf32>
    %60 = arith.addf %53, %59 : vector<8x256xf32>
    %61 = math.absf %57 : vector<8x256xf32>
    %cst_31 = arith.constant 0.000000e+00 : f32
    %62 = vector.broadcast %cst_31 : f32 to vector<8x256xf32>
    %63 = arith.subf %62, %61 : vector<8x256xf32>
    %64 = math.exp %63 : vector<8x256xf32>
    %65 = math.log1p %64 : vector<8x256xf32>
    %66 = arith.addf %55, %65 : vector<8x256xf32>
    %67 = arith.select %58, %60, %66 : vector<8x256xi1>, vector<8x256xf32>
    %68 = vector.extract_strided_slice %49 {offsets = [16, 0], sizes = [8, 256], strides = [1, 1]} : vector<40x256xf32> to vector<8x256xf32>
    %69 = vector.extract_strided_slice %49 {offsets = [24, 0], sizes = [8, 256], strides = [1, 1]} : vector<40x256xf32> to vector<8x256xf32>
    %cst_32 = arith.constant 0.000000e+00 : f32
    %70 = vector.broadcast %cst_32 : f32 to vector<8x256xf32>
    %71 = arith.maximumf %69, %70 : vector<8x256xf32>
    %72 = vector.broadcast %cst_32 : f32 to vector<8x256xf32>
    %73 = arith.subf %69, %72 : vector<8x256xf32>
    %74 = arith.cmpf one, %73, %73 : vector<8x256xf32>
    %75 = vector.broadcast %cst_32 : f32 to vector<8x256xf32>
    %76 = arith.addf %69, %75 : vector<8x256xf32>
    %77 = math.absf %73 : vector<8x256xf32>
    %cst_33 = arith.constant 0.000000e+00 : f32
    %78 = vector.broadcast %cst_33 : f32 to vector<8x256xf32>
    %79 = arith.subf %78, %77 : vector<8x256xf32>
    %80 = math.exp %79 : vector<8x256xf32>
    %81 = math.log1p %80 : vector<8x256xf32>
    %82 = arith.addf %71, %81 : vector<8x256xf32>
    %83 = arith.select %74, %76, %82 : vector<8x256xi1>, vector<8x256xf32>
    %84 = vector.extract_strided_slice %49 {offsets = [32, 0], sizes = [8, 256], strides = [1, 1]} : vector<40x256xf32> to vector<8x256xf32>
    %85 = arith.mulf %67, %1 : vector<8x256xf32>
    %86 = arith.addf %51, %85 : vector<8x256xf32>
    %c4 = arith.constant 4 : index
    %c0_34 = arith.constant 0 : index
    %c0_35 = arith.constant 0 : index
    %87 = vector.load %arg3[%c4, %c0_34, %c0_35] : memref<6x48x16xf32, #tpu.memory_space<vmem>>, vector<1x16x8xf32>
    %88 = vector.shape_cast %87 : vector<1x16x8xf32> to vector<16x8xf32>
    %cst_36 = arith.constant dense<0.000000e+00> : vector<16x256xf32>
    %89 = tpu.matmul %88, %86, %cst_36 {dimension_numbers = #tpu.dot_dimension_numbers<[1], [0], [0], [1], [0, 0, 1, 1], [], []>} : vector<16x8xf32>, vector<8x256xf32>, vector<16x256xf32> -> vector<16x256xf32>
    %c3_37 = arith.constant 3 : index
    %c0_38 = arith.constant 0 : index
    %c0_39 = arith.constant 0 : index
    %90 = vector.load %arg4[%c3_37, %c0_38, %c0_39] : memref<4x48x256xf32, #tpu.memory_space<vmem>>, vector<1x16x256xf32>
    %91 = vector.shape_cast %90 : vector<1x16x256xf32> to vector<16x256xf32>
    %92 = arith.addf %89, %91 : vector<16x256xf32>
    %93 = math.tanh %92 : vector<16x256xf32>
    %c5 = arith.constant 5 : index
    %c0_40 = arith.constant 0 : index
    %c0_41 = arith.constant 0 : index
    %94 = vector.load %arg3[%c5, %c0_40, %c0_41] : memref<6x48x16xf32, #tpu.memory_space<vmem>>, vector<1x8x16xf32>
    %95 = vector.shape_cast %94 : vector<1x8x16xf32> to vector<8x16xf32>
    %cst_42 = arith.constant dense<0.000000e+00> : vector<8x256xf32>
    %96 = tpu.matmul %95, %93, %cst_42 {dimension_numbers = #tpu.dot_dimension_numbers<[1], [0], [0], [1], [0, 0, 1, 1], [], []>} : vector<8x16xf32>, vector<16x256xf32>, vector<8x256xf32> -> vector<8x256xf32>
    %97 = arith.addf %84, %96 : vector<8x256xf32>
    %c0_43 = arith.constant 0 : index
    %c0_44 = arith.constant 0 : index
    %98 = vector.load %arg5[%c0_43, %c0_44] : memref<48x256xf32, #tpu.memory_space<vmem>>, vector<8x256xf32>
    tpu.vector_store %arg5[%c0_43, %c0_44], %97 {strides = array<i32>} : memref<48x256xf32, #tpu.memory_space<vmem>>, vector<8x256xf32>,
    %c8 = arith.constant 8 : index
    %c0_45 = arith.constant 0 : index
    %99 = vector.load %arg5[%c8, %c0_45] : memref<48x256xf32, #tpu.memory_space<vmem>>, vector<8x256xf32>
    tpu.vector_store %arg5[%c8, %c0_45], %51 {strides = array<i32>} : memref<48x256xf32, #tpu.memory_space<vmem>>, vector<8x256xf32>,
    %c16 = arith.constant 16 : index
    %c0_46 = arith.constant 0 : index
    %100 = vector.load %arg5[%c16, %c0_46] : memref<48x256xf32, #tpu.memory_space<vmem>>, vector<8x256xf32>
    tpu.vector_store %arg5[%c16, %c0_46], %67 {strides = array<i32>} : memref<48x256xf32, #tpu.memory_space<vmem>>, vector<8x256xf32>,
    %c24 = arith.constant 24 : index
    %c0_47 = arith.constant 0 : index
    %101 = vector.load %arg5[%c24, %c0_47] : memref<48x256xf32, #tpu.memory_space<vmem>>, vector<8x256xf32>
    tpu.vector_store %arg5[%c24, %c0_47], %68 {strides = array<i32>} : memref<48x256xf32, #tpu.memory_space<vmem>>, vector<8x256xf32>,
    %c32 = arith.constant 32 : index
    %c0_48 = arith.constant 0 : index
    %102 = vector.load %arg5[%c32, %c0_48] : memref<48x256xf32, #tpu.memory_space<vmem>>, vector<8x256xf32>
    tpu.vector_store %arg5[%c32, %c0_48], %83 {strides = array<i32>} : memref<48x256xf32, #tpu.memory_space<vmem>>, vector<8x256xf32>,
    %c40 = arith.constant 40 : index
    %c0_49 = arith.constant 0 : index
    %103 = vector.load %arg5[%c40, %c0_49] : memref<48x256xf32, #tpu.memory_space<vmem>>, vector<8x256xf32>
    tpu.vector_store %arg5[%c40, %c0_49], %86 {strides = array<i32>} : memref<48x256xf32, #tpu.memory_space<vmem>>, vector<8x256xf32>,
    return
  }
  func.func @transform_0(%arg0: i32) -> (i32, i32) {
    %c0_i32 = arith.constant 0 : i32
    %c0_i32_0 = arith.constant 0 : i32
    %c0_i32_1 = arith.constant 0 : i32
    return %c0_i32, %c0_i32_0 : i32, i32
  }
  func.func @transform_1(%arg0: i32) -> (i32, i32) {
    %c0_i32 = arith.constant 0 : i32
    %c0_i32_0 = arith.constant 0 : i32
    %c0_i32_1 = arith.constant 0 : i32
    return %c0_i32, %c0_i32_0 : i32, i32
  }
  func.func @transform_2(%arg0: i32) -> (i32, i32, i32) {
    %c0_i32 = arith.constant 0 : i32
    %c0_i32_0 = arith.constant 0 : i32
    %c0_i32_1 = arith.constant 0 : i32
    %c0_i32_2 = arith.constant 0 : i32
    return %c0_i32, %c0_i32_0, %c0_i32_1 : i32, i32, i32
  }
  func.func @transform_3(%arg0: i32) -> (i32, i32, i32) {
    %c0_i32 = arith.constant 0 : i32
    %c0_i32_0 = arith.constant 0 : i32
    %c0_i32_1 = arith.constant 0 : i32
    %c0_i32_2 = arith.constant 0 : i32
    return %c0_i32, %c0_i32_0, %c0_i32_1 : i32, i32, i32
  }
  func.func @transform_4(%arg0: i32) -> (i32, i32) {
    %c0_i32 = arith.constant 0 : i32
    %c0_i32_0 = arith.constant 0 : i32
    %c0_i32_1 = arith.constant 0 : i32
    return %c0_i32, %c0_i32_0 : i32, i32
  }
}

</mosaic_0001>

<bundles_post_ra>
// kernel: tpu_custom_call.1
= control target key start
LH: loop header
LB: loop body
LE: loop exit
PB: predicated region body
PF: predicated region fallthrough
CT: control target
= control target key end

     0   :  { %9 = vsyncpa [#allocation3], 0  ;;  %s1263_s0 = inlined_call_operand.hbm [shape: f32[16,256], index: 0, kind: input, shape index: {}]   ;;  %s1264_s1 = inlined_call_operand.hbm [shape: f32[8,256], index: 1, kind: input, shape index: {}]   ;;  %s1265_s2 = inlined_call_operand.vmem [shape: f32[6,48,16], index: 2, kind: input, shape index: {}]   ;;  %s1266_s3 = inlined_call_operand.vmem [shape: f32[4,48,256], index: 3, kind: input, shape index: {}]   ;;  %s1267_s4 = inlined_call_operand.hbm [shape: f32[48,256], index: 4, kind: output, shape index: {}]  }
   0x1   :  { %10 = vsyncpa [#allocation6], 0 }
   0x2   :  { %11 = vsyncpa [#allocation4], 0  ;;  %s1033_s15 = smov [#allocation2]   ;;  %s961_s19 = scalar_lea.hbm %s1263_s0, 512 }
   0x3   :  { %s17_s16 = sshll.u32 %s1033_s15, 4  ;;  %p962_p0 = scmp.ne.s32.totalorder %s1263_s0, %s961_s19  ;;  %s18_s16 = int_to_ptr.vmem [resolvable:$true] %s17_s16 }
   0x4   :  { %p965_p1 = scmp.lt.u32.totalorder %s961_s19, %s1263_s0 }
   0x6   :  { %p967_p2 = pnand %p965_p1, %p962_p0 }
   0x8   :  { %970 = shalt.err (!%p967_p2)
}
   0x9   :  { %s971_s24 = scalar_lea.vmem %s18_s16, 512  ;;  %p976_p4 = scmp.lt.s32.totalorder %s18_s16, %s18_s16 }
   0xa   :  { %p972_p3 = scmp.ne.s32.totalorder %s18_s16, %s971_s24  ;;  %p977_p5 = scmp.lt.s32.totalorder %s971_s24, %s971_s24 }
   0xc   :  { %p978_p6 = por %p977_p5, %p976_p4 }
   0xe   :  { %p979_p7 = pnand %p978_p6, %p972_p3 }
  0x10   :  { %982 = shalt.err (!%p979_p7)
}
  0x11   :  { %s1034_s25 = smov 256   ;;  %s1035_s26 = smov 16  }
  0x12   :  { %23 = dma.hbm_to_vmem [thread:$0]  %s1263_s0, 512, %s18_s16, [#allocation3], %s1034_s25, %s1034_s25, %s1035_s26  }
  0x13   :  { %s1036_s29 = smov [#allocation5]   ;;  %s983_s7 = scalar_lea.hbm %s1264_s1, 256 }
  0x14   :  { %s30_s30 = sshll.u32 %s1036_s29, 4  ;;  %p984_p8 = scmp.ne.s32.totalorder %s1264_s1, %s983_s7  ;;  %s31_s30 = int_to_ptr.vmem [resolvable:$true] %s30_s30 }
  0x15   :  { %p987_p9 = scmp.lt.u32.totalorder %s983_s7, %s1264_s1 }
  0x17   :  { %p989_p10 = pnand %p987_p9, %p984_p8 }
  0x19   :  { %992 = shalt.err (!%p989_p10)
}
  0x1a   :  { %s993_s12 = scalar_lea.vmem %s31_s30, 256  ;;  %p998_p12 = scmp.lt.s32.totalorder %s31_s30, %s31_s30 }
  0x1b   :  { %p994_p11 = scmp.ne.s32.totalorder %s31_s30, %s993_s12  ;;  %p999_p13 = scmp.lt.s32.totalorder %s993_s12, %s993_s12 }
  0x1d   :  { %p1000_p0 = por %p999_p13, %p998_p12 }
  0x1f   :  { %p1001_p1 = pnand %p1000_p0, %p994_p11 }
  0x21   :  { %1004 = shalt.err (!%p1001_p1)
}
  0x22   :  { %33 = dma.hbm_to_vmem [thread:$0]  %s1264_s1, 256, %s31_s30, [#allocation6]  }
  0x23   :  { %1027 = dma.done.wait [#allocation3], 512  }
  0x24   :  { %1028 = vsyncadd [#allocation3], 4294966784 }
  0x25   :  { %1029 = dma.done.wait [#allocation6], 256  }
  0x26   :  { %1030 = vsyncadd [#allocation6], 4294967040  ;;  %v1037_v0 = vmov 0.0   ;;  %v45_v1 = vld [vmem:[#allocation2 + $0x8] sm:$0xff]  ;;  %v47_v2 = vld [vmem:[#allocation2 + $0x18] sm:$0xff]  ;;  %vm52_vm0 = vcmask 130048   ;;  %v254_v35 = vlaneseq }
  0x27   :  { %123 = vmatprep.mubr.f32.mxu0 %v1037_v0  ;;  %241 = vmatprep.mubr.f32.mxu1 %v1037_v0  ;;  %v44_v3 = vld [vmem:[#allocation2] sm:$0xff]  ;;  %v864_v4 = vpack.c.bf16 %v47_v2, %v45_v1  ;;  %v46_v5 = vld [vmem:[#allocation2 + $0x10] sm:$0xff]  ;;  %v51_v8 = vld [vmem:[%s1265_s2 + $0x8] sm:$0xff]  ;;  %s1038_s5 = smov 1   ;;  %vm610_vm10 = vcmask 64512   ;;  %s1039_s20 = smov [#allocation7]  }
  0x28   :  { %v866_v6 = vpack.c.bf16 %v46_v5, %v44_v3  ;;  %v50_v7 = vld [vmem:[%s1265_s2] sm:$0xff]  ;;  %v808_v19 = vld [vmem:[%s1265_s2 + $0x30] sm:$0xff]  ;;  %v809_v20 = vld [vmem:[%s1265_s2 + $0x38] sm:$0xff]  ;;  %v255_v36 = vand.u32 127, %v254_v35  ;;  %s793_s21 = sshll.u32 %s1039_s20, 4  ;;  %s794_s21 = int_to_ptr.vmem [resolvable:$true] %s793_s21 }
  0x29   :  { %865 = vmatprep.subr.bf16.mxu0 %v864_v4  ;;  %v145_v23 = vld [vmem:[%s1266_s3] sm:$0xff]  ;;  %v147_v24 = vld [vmem:[%s1266_s3 + $0x10] sm:$0xff]  ;;  %v146_v25 = vld [vmem:[%s1266_s3 + $0x8] sm:$0xff]  ;;  %p1010_p3 = scmp.lt.s32.totalorder %s794_s21, %s794_s21 }
  0x2a   :  { %867 = vmatpush1.bf16.msra.mxu0 %v866_v6  ;;  %v148_v26 = vld [vmem:[%s1266_s3 + $0x18] sm:$0xff]  ;;  %v256_v37 = vadd.s32 128, %v255_v36  ;;  %vm291_vm1 = vcmp.lt.s32.totalorder %v255_v36, 1  ;;  %vm863_vm3 = vcmp.ne.s32.totalorder %v255_v36, 0  ;;  %v816_v51 = vld [vmem:[%s1265_s2 + $0x60] sm:$0xff]  ;;  %v817_v52 = vld [vmem:[%s1265_s2 + $0x68] sm:$0xff] }
  0x2b   :  { %vm876_vm5 = vmpackc.low %vm863_vm3, %vm863_vm3  ;;  %v810_v53 = vld [vmem:[%s1265_s2 + $0x40] sm:$0xff]  ;;  %v811_v54 = vld [vmem:[%s1265_s2 + $0x48] sm:$0xff] }
  0x2c   :  { %v268_v39 = vand.u32 127, %v256_v37  ;;  %v818_v55 = vld [vmem:[%s1266_s3 + $0x60] sm:$0xff]  ;;  %v819_v56 = vld [vmem:[%s1266_s3 + $0x68] sm:$0xff]  ;;  %v820_v61 = vld [vmem:[%s1266_s3 + $0x70] sm:$0xff] }
  0x2d   :  { %806 = vmatmul.mubr.msk.f32.vlgmr.msra.gmra.mrb[0].mxu0 %vm52_vm0, %v50_v7  ;;  %v821_v62 = vld [vmem:[%s1266_s3 + $0x78] sm:$0xff] }
  0x2e   :  { %129 = vmatprep.mubr.f32.mxu0 %v1037_v0  ;;  %vm862_vm2 = vcmp.ne.s32.totalorder %v268_v39, 0 }
  0x2f   :  { %vm873_vm4 = vmpackc.low %vm862_vm2, %vm862_vm2 }
  0x31   :  { %807 = vmatmul.mubr.msk.f32.gmra.mrb[2].mxu0 %vm52_vm0, %v51_v8 }
  0x32   :  { %229 = vmatprep.mubr.f32.mxu0 %v1037_v0 }
 0x100   :  { %v125_v9 = vpop.f32.mrb[0].mxu0 }
 0x101   :  { %v127_v10 = vpop.f32.mrb[1].mxu0  ;;  %921 = vtanh.f32 %v125_v9 }
 0x102   :  { %923 = vtanh.f32 %v127_v10  ;;  %v832_v10 = vld [vmem:[%s1265_s2 + $0x90] sm:$0xff] }
 0x104   :  { %v131_v11 = vpop.f32.mrb[2].mxu0 }
 0x105   :  { %925 = vtanh.f32 %v131_v11  ;;  %v133_v12 = vpop.f32.mrb[3].mxu0  ;;  %v833_v11 = vld [vmem:[%s1265_s2 + $0x98] sm:$0xff] }
 0x106   :  { %927 = vtanh.f32 %v133_v12  ;;  %v834_v12 = vld [vmem:[%s1265_s2 + $0xa0] sm:$0xff] }
 0x10b   :  { %v922_v13 = vpop.eup %921 }
 0x10c   :  { %v924_v14 = vpop.eup %923 }
 0x10f   :  { %v926_v15 = vpop.eup %925 }
 0x110   :  { %v928_v16 = vpop.eup %927  ;;  %v870_v17 = vpack.c.bf16 %v926_v15, %v922_v13  ;;  %v835_v13 = vld [vmem:[%s1265_s2 + $0xa8] sm:$0xff]  ;;  %v837_v15 = vld [vmem:[%s1266_s3 + $0xc0] sm:$0xff] }
 0x111   :  { %v868_v18 = vpack.c.bf16 %v928_v16, %v924_v14  ;;  %v149_v14 = vld [vmem:[%s1266_s3 + $0x20] sm:$0xff]  ;;  %v150_v16 = vld [vmem:[%s1266_s3 + $0x28] sm:$0xff] }
 0x113   :  { %869 = vmatprep.subr.bf16.mxu0 %v868_v18  ;;  %886 = vmatprep.subr.bf16.mxu1 %v868_v18  ;;  %v888_v18 = vadd.f32 %v837_v15, %v149_v14 }
 0x114   :  { %871 = vmatpush1.bf16.msra.mxu0 %v870_v17  ;;  %887 = vmatpush1.bf16.msra.mxu1 %v870_v17  ;;  %v838_v17 = vld [vmem:[%s1266_s3 + $0xc8] sm:$0xff] }
 0x117   :  { %812 = vmatmul.mubr.msk.f32.vlgmr.msra.gmra.mrb[4].mxu0 %vm52_vm0, %v808_v19  ;;  %814 = vmatmul.mubr.msk.f32.vlgmr.msra.gmra.mrb[0].mxu1 %vm52_vm0, %v810_v53  ;;  %v890_v19 = vadd.f32 %v838_v17, %v150_v16  ;;  %v844_v16 = vld [vmem:[%s1266_s3 + $0xf8] sm:$0xff] }
 0x118   :  { %235 = vmatprep.mubr.f32.mxu0 %v1037_v0  ;;  %247 = vmatprep.mubr.f32.mxu1 %v1037_v0 }
 0x11b   :  { %813 = vmatmul.mubr.msk.f32.gmra.mrb[6].mxu0 %vm52_vm0, %v809_v20  ;;  %815 = vmatmul.mubr.msk.f32.gmra.mrb[2].mxu1 %vm52_vm0, %v811_v54  ;;  %v151_v20 = vld [vmem:[%s1266_s3 + $0x30] sm:$0xff] }
 0x11c   :  { %378 = vmatprep.mubr.f32.mxu0 %v1037_v0  ;;  %491 = vmatprep.mubr.f32.mxu1 %v1037_v0 }
 0x1ea   :  { %v231_v21 = vpop.f32.mrb[4].mxu0 }
 0x1eb   :  { %v233_v22 = vpop.f32.mrb[5].mxu0  ;;  %v232_v28 = vadd.f32 %v231_v21, %v145_v23  ;;  %v839_v21 = vld [vmem:[%s1266_s3 + $0xd0] sm:$0xff]  ;;  %v840_v23 = vld [vmem:[%s1266_s3 + $0xd8] sm:$0xff] }
 0x1ec   :  { %v234_v31 = vadd.f32 %v233_v22, %v146_v25  ;;  %v152_v22 = vld [vmem:[%s1266_s3 + $0x38] sm:$0xff] }
 0x1ee   :  { %v237_v27 = vpop.f32.mrb[6].mxu0 }
 0x1ef   :  { %v238_v29 = vadd.f32 %v237_v27, %v147_v24  ;;  %v239_v30 = vpop.f32.mrb[7].mxu0  ;;  %v892_v27 = vadd.f32 %v839_v21, %v151_v20 }
 0x1f0   :  { %v240_v32 = vadd.f32 %v239_v30, %v148_v26 }
 0x1f1   :  { %v911_v33 = vpack.i.bf16 %v238_v29, %v232_v28  ;;  %v894_v29 = vadd.f32 %v840_v23, %v152_v22 }
 0x1f2   :  { %v916_v34 = vpack.i.bf16 %v240_v32, %v234_v31 }
 0x1f3   :  { %912 = vrot.lane.b32.xlu0 %v911_v33, %s1038_s5 }
 0x1f7   :  { %917 = vrot.lane.b32.xlu0 %v916_v34, %s1038_s5 }
 0x265   :  { %v913_v38 = vpop.permute.xlu0 %912 }
 0x266   :  { %v915_v41 = vunpack.i.h.bf16 %v913_v38  ;;  %v914_v42 = vunpack.i.l.bf16 %v913_v38 }
 0x269   :  { %v918_v40 = vpop.permute.xlu0 %917 }
 0x26a   :  { %v920_v43 = vunpack.i.h.bf16 %v918_v40  ;;  %v919_v44 = vunpack.i.l.bf16 %v918_v40 }
 0x26c   :  { %v292_v45 = vsel %vm291_vm1, %v914_v42, %v919_v44  ;;  %v293_v46 = vsel %vm291_vm1, %v915_v41, %v920_v43  ;;  %v294_v47 = vsel %vm291_vm1, %v919_v44, %v914_v42  ;;  %v295_v48 = vsel %vm291_vm1, %v920_v43, %v915_v41 }
 0x26d   :  { %v872_v49 = vpack.c.bf16 %v293_v46, %v292_v45  ;;  %v875_v50 = vpack.c.bf16 %v295_v48, %v294_v47 }
 0x26f   :  { %874 = vmatprep.subr.msk.bf16.mxu0 %vm873_vm4, %v872_v49 }
 0x270   :  { %877 = vmatpush1.bf16.msk.msra.mxu0 %vm876_vm5, %v875_v50 }
 0x273   :  { %830 = vmatmul.mubr.msk.f32.vlgmr.msra.gmra.mrb[8].mxu0 %vm52_vm0, %v816_v51 }
 0x274   :  { %384 = vmatprep.mubr.f32.mxu0 %v1037_v0 }
 0x277   :  { %831 = vmatmul.mubr.msk.f32.gmra.mrb[10].mxu0 %vm52_vm0, %v817_v52 }
 0x278   :  { %681 = vmatprep.mubr.f32.mxu0 %v1037_v0 }
 0x346   :  { %v380_v57 = vpop.f32.mrb[8].mxu0 }
 0x347   :  { %v381_v58 = vadd.f32 %v818_v55, %v380_v57  ;;  %v382_v59 = vpop.f32.mrb[9].mxu0 }
 0x348   :  { %v383_v60 = vadd.f32 %v819_v56, %v382_v59 }
 0x349   :  { %929 = vtanh.f32 %v381_v58 }
 0x34a   :  { %v386_v63 = vpop.f32.mrb[10].mxu0  ;;  %931 = vtanh.f32 %v383_v60 }
 0x34b   :  { %v387_v1 = vadd.f32 %v820_v61, %v386_v63  ;;  %v388_v2 = vpop.f32.mrb[11].mxu0  ;;  %v48_v61 = vld [vmem:[#allocation5] sm:$0xff]  ;;  %v49_v63 = vld [vmem:[#allocation5 + $0x8] sm:$0xff] }
 0x34c   :  { %v389_v3 = vadd.f32 %v821_v62, %v388_v2 }
 0x34d   :  { %933 = vtanh.f32 %v387_v1 }
 0x34e   :  { %935 = vtanh.f32 %v389_v3 }
 0x353   :  { %v930_v4 = vpop.eup %929 }
 0x354   :  { %v932_v5 = vpop.eup %931 }
 0x357   :  { %v934_v6 = vpop.eup %933 }
 0x358   :  { %v936_v7 = vpop.eup %935  ;;  %v880_v8 = vpack.c.bf16 %v934_v6, %v930_v4 }
 0x359   :  { %v878_v9 = vpack.c.bf16 %v936_v7, %v932_v5  ;;  %v852_v7 = vld [vmem:[%s1265_s2 + $0xc0] sm:$0xff] }
 0x35b   :  { %879 = vmatprep.subr.bf16.mxu1 %v878_v9  ;;  %v836_v9 = vld [vmem:[%s1265_s2 + $0xb0] sm:$0xff] }
 0x35c   :  { %881 = vmatpush1.bf16.msra.mxu1 %v880_v8  ;;  %v853_v8 = vld [vmem:[%s1265_s2 + $0xc8] sm:$0xff] }
 0x35f   :  { %847 = vmatmul.mubr.msk.f32.vlgmr.msra.gmra.mrb[0].mxu1 %vm52_vm0, %v832_v10  ;;  %v841_v10 = vld [vmem:[%s1266_s3 + $0xe0] sm:$0xff] }
 0x360   :  { %497 = vmatprep.mubr.f32.mxu1 %v1037_v0 }
 0x363   :  { %848 = vmatmul.mubr.msk.f32.gmra.mrb[2].mxu1 %vm52_vm0, %v833_v11 }
 0x364   :  { %503 = vmatprep.mubr.f32.mxu1 %v1037_v0 }
 0x367   :  { %849 = vmatmul.mubr.msk.f32.gmra.mrb[4].mxu1 %vm52_vm0, %v834_v12  ;;  %v842_v12 = vld [vmem:[%s1266_s3 + $0xe8] sm:$0xff] }
 0x368   :  { %509 = vmatprep.mubr.f32.mxu1 %v1037_v0 }
 0x36b   :  { %850 = vmatmul.mubr.msk.f32.gmra.mrb[6].mxu1 %vm52_vm0, %v835_v13  ;;  %v843_v13 = vld [vmem:[%s1266_s3 + $0xf0] sm:$0xff] }
 0x36c   :  { %515 = vmatprep.mubr.f32.mxu1 %v1037_v0 }
 0x36f   :  { %851 = vmatmul.mubr.msk.f32.gmra.mrb[8].mxu1 %vm52_vm0, %v836_v9 }
 0x370   :  { %767 = vmatprep.mubr.f32.mxu1 %v1037_v0 }
 0x432   :  { %v493_v24 = vpop.f32.mrb[0].mxu1 }
 0x433   :  { %v889_v25 = vadd.f32 %v888_v18, %v493_v24  ;;  %v495_v26 = vpop.f32.mrb[1].mxu1 }
 0x434   :  { %v891_v28 = vadd.f32 %v890_v19, %v495_v26 }
 0x435   :  { %778 = vst [vmem:[#allocation7 + $0x10] sm:$0xff] %v889_v25 }
 0x436   :  { %779 = vst [vmem:[#allocation7 + $0x18] sm:$0xff] %v891_v28  ;;  %v499_v30 = vpop.f32.mrb[2].mxu1 }
 0x437   :  { %v893_v31 = vadd.f32 %v892_v27, %v499_v30  ;;  %v501_v32 = vpop.f32.mrb[3].mxu1 }
 0x438   :  { %v895_v33 = vadd.f32 %v894_v29, %v501_v32 }
 0x439   :  { %v532_v34 = vand.u32 2147483647, %v893_v31  ;;  %v526_v54 = vmax.f32 %v893_v31, 0.0  ;;  %vm528_vm8 = vcmp.ne.f32.partialorder %v893_v31, %v893_v31 }
 0x43a   :  { %v533_v35 = vand.u32 2147483647, %v895_v33  ;;  %v527_v58 = vmax.f32 %v895_v33, 0.0  ;;  %vm529_vm9 = vcmp.ne.f32.partialorder %v895_v33, %v895_v33  ;;  %v505_v11 = vpop.f32.mrb[4].mxu1 }
 0x43b   :  { %v534_v36 = vsub.f32 0.0, %v532_v34  ;;  %v506_v14 = vadd.f32 %v841_v10, %v505_v11  ;;  %v507_v15 = vpop.f32.mrb[5].mxu1 }
 0x43c   :  { %v535_v37 = vsub.f32 0.0, %v533_v35 }
 0x43d   :  { %v536_v38 = vmul.f32 1.442695, %v534_v36  ;;  %782 = vst [vmem:[#allocation7 + $0x30] sm:$0xff] %v506_v14 }
 0x43e   :  { %v538_v39 = vmul.f32 1.442695, %v535_v37  ;;  %v511_v17 = vpop.f32.mrb[6].mxu1 }
 0x43f   :  { %937 = vpow2.f32 %v536_v38  ;;  %v512_v18 = vadd.f32 %v843_v13, %v511_v17  ;;  %v513_v19 = vpop.f32.mrb[7].mxu1 }
 0x440   :  { %939 = vpow2.f32 %v538_v39  ;;  %v514_v20 = vadd.f32 %v844_v16, %v513_v19 }
 0x441   :  { %v568_v21 = vand.u32 2147483647, %v512_v18  ;;  %v562_v39 = vmax.f32 %v512_v18, 0.0  ;;  %vm564_vm13 = vcmp.ne.f32.partialorder %v512_v18, %v512_v18 }
 0x442   :  { %v569_v22 = vand.u32 2147483647, %v514_v20  ;;  %vm565_vm14 = vcmp.ne.f32.partialorder %v514_v20, %v514_v20 }
 0x443   :  { %v570_v23 = vsub.f32 0.0, %v568_v21 }
 0x444   :  { %v571_v24 = vsub.f32 0.0, %v569_v22 }
 0x446   :  { %v574_v26 = vmul.f32 1.442695, %v571_v24 }
 0x449   :  { %v938_v40 = vpop.eup %937 }
 0x44a   :  { %v940_v41 = vpop.eup %939  ;;  %v540_v42 = vadd.f32 1.0, %v938_v40  ;;  %v543_v44 = vmul.f32 -0.5, %v938_v40  ;;  %v546_v47 = vand.u32 2147483647, %v938_v40 }
 0x44b   :  { %v549_v43 = vadd.f32 1.0, %v940_v41  ;;  %v552_v45 = vmul.f32 -0.5, %v940_v41  ;;  %v555_v49 = vand.u32 2147483647, %v940_v41 }
 0x44c   :  { %941 = vlog2.f32 %v540_v42  ;;  %v544_v46 = vadd.f32 1.0, %v543_v44  ;;  %vm547_vm6 = vcmp.lt.f32.partialorder %v546_v47, 0.0004427343 }
 0x44d   :  { %943 = vlog2.f32 %v549_v43  ;;  %v553_v48 = vadd.f32 1.0, %v552_v45  ;;  %vm556_vm7 = vcmp.lt.f32.partialorder %v555_v49, 0.0004427343  ;;  %v563_v43 = vmax.f32 %v514_v20, 0.0 }
 0x44e   :  { %v545_v53 = vmul.f32 %v938_v40, %v544_v46 }
 0x44f   :  { %v554_v56 = vmul.f32 %v940_v41, %v553_v48 }
 0x456   :  { %v942_v50 = vpop.eup %941 }
 0x457   :  { %v944_v51 = vpop.eup %943  ;;  %v542_v52 = vmul.f32 0.6931472, %v942_v50 }
 0x458   :  { %v551_v55 = vmul.f32 0.6931472, %v944_v51  ;;  %v854_v51 = vld [vmem:[%s1266_s3 + $0x120] sm:$0xff] }
 0x459   :  { %v548_v57 = vsel %vm547_vm6, %v545_v53, %v542_v52  ;;  %v855_v52 = vld [vmem:[%s1266_s3 + $0x128] sm:$0xff] }
 0x45a   :  { %v558_v59 = vadd.f32 %v548_v57, %v526_v54  ;;  %v557_v60 = vsel %vm556_vm7, %v554_v56, %v551_v55  ;;  %v856_v57 = vld [vmem:[%s1266_s3 + $0x130] sm:$0xff] }
 0x45b   :  { %v559_v62 = vadd.f32 %v557_v60, %v527_v58  ;;  %v857_v58 = vld [vmem:[%s1266_s3 + $0x138] sm:$0xff] }
 0x45c   :  { %v560_v1 = vsel %vm528_vm8, %v893_v31, %v558_v59 }
 0x45d   :  { %780 = vst [vmem:[#allocation7 + $0x20] sm:$0xff] %v560_v1  ;;  %v561_v2 = vsel %vm529_vm9, %v895_v33, %v559_v62  ;;  %v598_v3 = vmul.f32 %v560_v1, %v48_v61 }
 0x45e   :  { %v599_v4 = vmul.f32 %v561_v2, %v49_v63  ;;  %781 = vst [vmem:[#allocation7 + $0x28] sm:$0xff] %v561_v2 }
 0x45f   :  { %v600_v5 = vadd.f32 %v889_v25, %v598_v3  ;;  %v572_v25 = vmul.f32 1.442695, %v570_v23 }
 0x460   :  { %v601_v6 = vadd.f32 %v891_v28, %v599_v4 }
 0x461   :  { %786 = vst [vmem:[#allocation7 + $0x50] sm:$0xff] %v600_v5  ;;  %945 = vpow2.f32 %v572_v25 }
 0x462   :  { %617 = vmatprep.subr.mxu0 %v601_v6  ;;  %787 = vst [vmem:[#allocation7 + $0x58] sm:$0xff] %v601_v6  ;;  %947 = vpow2.f32 %v574_v26  ;;  %v860_v6 = vld [vmem:[%s1265_s2 + $0xf0] sm:$0xff]  ;;  %s1005_s2 = scalar_lea.vmem %s794_s21, 1536 }
 0x463   :  { %618 = vmatpush1.msra.mxu0 %v600_v5  ;;  %p1006_p2 = scmp.ne.s32.totalorder %s794_s21, %s1005_s2  ;;  %p1011_p4 = scmp.lt.s32.totalorder %s1005_s2, %s1005_s2 }
 0x464   :  { %858 = vmatmul.mubr.msk.f32.vlgmr.msra.gmra.mrb[12].mxu0 %vm610_vm10, %v852_v7  ;;  %v845_v7 = vld [vmem:[%s1266_s3 + $0x100] sm:$0xff] }
 0x465   :  { %687 = vmatprep.mubr.f32.mxu0 %v1037_v0  ;;  %v508_v0 = vadd.f32 %v842_v12, %v507_v15  ;;  %p1012_p5 = por %p1011_p4, %p1010_p3 }
 0x467   :  { %783 = vst [vmem:[#allocation7 + $0x38] sm:$0xff] %v508_v0  ;;  %p1013_p6 = pnand %p1012_p5, %p1006_p2 }
 0x468   :  { %859 = vmatmul.mubr.msk.f32.gmra.mrb[14].mxu0 %vm610_vm10, %v853_v8  ;;  %v846_v8 = vld [vmem:[%s1266_s3 + $0x108] sm:$0xff] }
 0x46b   :  { %v946_v27 = vpop.eup %945 }
 0x46c   :  { %v948_v28 = vpop.eup %947  ;;  %v576_v29 = vadd.f32 1.0, %v946_v27  ;;  %v579_v31 = vmul.f32 -0.5, %v946_v27  ;;  %v582_v34 = vand.u32 2147483647, %v946_v27 }
 0x46d   :  { %v585_v30 = vadd.f32 1.0, %v948_v28  ;;  %v588_v32 = vmul.f32 -0.5, %v948_v28  ;;  %v591_v36 = vand.u32 2147483647, %v948_v28 }
 0x46e   :  { %949 = vlog2.f32 %v576_v29  ;;  %v580_v33 = vadd.f32 1.0, %v579_v31  ;;  %vm583_vm11 = vcmp.lt.f32.partialorder %v582_v34, 0.0004427343 }
 0x46f   :  { %951 = vlog2.f32 %v585_v30  ;;  %v589_v35 = vadd.f32 1.0, %v588_v32  ;;  %vm592_vm12 = vcmp.lt.f32.partialorder %v591_v36, 0.0004427343 }
 0x470   :  { %v581_v37 = vmul.f32 %v946_v27, %v580_v33 }
 0x471   :  { %v590_v40 = vmul.f32 %v948_v28, %v589_v35 }
 0x478   :  { %v950_v38 = vpop.eup %949 }
 0x479   :  { %v952_v41 = vpop.eup %951  ;;  %v578_v42 = vmul.f32 0.6931472, %v950_v38 }
 0x47a   :  { %v587_v44 = vmul.f32 0.6931472, %v952_v41 }
 0x47b   :  { %v584_v45 = vsel %vm583_vm11, %v581_v37, %v578_v42 }
 0x47c   :  { %v594_v46 = vadd.f32 %v584_v45, %v562_v39  ;;  %v593_v47 = vsel %vm592_vm12, %v590_v40, %v587_v44 }
 0x47d   :  { %v595_v48 = vadd.f32 %v593_v47, %v563_v43 }
 0x47e   :  { %v596_v49 = vsel %vm564_vm13, %v512_v18, %v594_v46 }
 0x47f   :  { %784 = vst [vmem:[#allocation7 + $0x40] sm:$0xff] %v596_v49  ;;  %v597_v50 = vsel %vm565_vm14, %v514_v20, %v595_v48 }
 0x480   :  { %785 = vst [vmem:[#allocation7 + $0x48] sm:$0xff] %v597_v50 }
 0x537   :  { %v683_v53 = vpop.f32.mrb[12].mxu0 }
 0x538   :  { %v684_v54 = vadd.f32 %v854_v51, %v683_v53  ;;  %v685_v55 = vpop.f32.mrb[13].mxu0 }
 0x539   :  { %v686_v56 = vadd.f32 %v855_v52, %v685_v55 }
 0x53a   :  { %953 = vtanh.f32 %v684_v54 }
 0x53b   :  { %v689_v59 = vpop.f32.mrb[14].mxu0  ;;  %955 = vtanh.f32 %v686_v56 }
 0x53c   :  { %v690_v60 = vadd.f32 %v856_v57, %v689_v59  ;;  %v691_v61 = vpop.f32.mrb[15].mxu0 }
 0x53d   :  { %v692_v62 = vadd.f32 %v857_v58, %v691_v61 }
 0x53e   :  { %957 = vtanh.f32 %v690_v60 }
 0x53f   :  { %959 = vtanh.f32 %v692_v62 }
 0x544   :  { %v954_v63 = vpop.eup %953 }
 0x545   :  { %v956_v1 = vpop.eup %955 }
 0x548   :  { %v958_v2 = vpop.eup %957 }
 0x549   :  { %v960_v3 = vpop.eup %959  ;;  %v884_v4 = vpack.c.bf16 %v958_v2, %v954_v63 }
 0x54a   :  { %v882_v5 = vpack.c.bf16 %v960_v3, %v956_v1 }
 0x54c   :  { %883 = vmatprep.subr.bf16.mxu1 %v882_v5 }
 0x54d   :  { %885 = vmatpush1.bf16.msra.mxu1 %v884_v4 }
 0x550   :  { %861 = vmatmul.mubr.msk.f32.vlgmr.msra.gmra.mrb[8].mxu1 %vm52_vm0, %v860_v6 }
 0x623   :  { %v769_v9 = vpop.f32.mrb[8].mxu1 }
 0x624   :  { %v896_v10 = vadd.f32 %v845_v7, %v769_v9  ;;  %v771_v11 = vpop.f32.mrb[9].mxu1 }
 0x625   :  { %v897_v12 = vadd.f32 %v846_v8, %v771_v11 }
 0x626   :  { %776 = vst [vmem:[#allocation7] sm:$0xff] %v896_v10 }
 0x627   :  { %777 = vst [vmem:[#allocation7 + $0x8] sm:$0xff] %v897_v12 }
 0x628   :  { %1016 = shalt.err (!%p1013_p6)
}
 0x629   :  { %s1017_s3 = scalar_lea.hbm %s1267_s4, 1536 }
 0x62a   :  { %p1018_p7 = scmp.ne.s32.totalorder %s1267_s4, %s1017_s3  ;;  %p1021_p8 = scmp.lt.u32.totalorder %s1017_s3, %s1267_s4 }
 0x62c   :  { %p1023_p9 = pnand %p1021_p8, %p1018_p7 }
 0x62e   :  { %1026 = shalt.err (!%p1023_p9)
}
 0x62f   :  { %799 = dma.vmem_to_hbm [thread:$0]  %s794_s21, 1536, %s1267_s4, [#allocation4], %s1034_s25, %s1034_s25, %s1035_s26  }
 0x630   :  { %1031 = dma.done.wait [#allocation4], 1536  }
 0x631   :  { %1032 = vsyncadd [#allocation4], 4294965760 }
 0x632   :  { %803 = vsyncpa [#allocation3], 1 }
 0x633   :  { %804 = vsyncpa [#allocation6], 1 }
 0x634   :  { %805 = vsyncpa [#allocation4], 1 }

</bundles_post_ra>
